<compile_context>
chip_gen: v5e
topology: v5e:2x2
jax: 0.10.0
libtpu: 0.0.40
codegen_flags: <defaults>
</compile_context>

<pallas_src>
import functools

import jax
import jax.numpy as jnp
from jax import lax
from jax.experimental import pallas as pl
from jax.experimental.pallas import tpu as pltpu


def _round_up(a, m):
    return (a + m - 1) // m * m


def _sum_all(a):
    """(R, C) -> (1, 1) total sum: lane reduce (XLU) then sublane reduce."""
    return jnp.sum(jnp.sum(a, axis=1, keepdims=True), axis=0, keepdims=True)


def _successive_ec_kernel(xi_ref, xtj_ref, tcol_ref, trow_ref, sqc_ref, sqr_ref,
                          out_ref, *, lam, alpha, margin_s, margin_d,
                          B, D, TI, TJ):
    i = pl.program_id(0)      # row-block index   ("parallel")
    j = pl.program_id(1)      # col-block index   ("arbitrary" / reduction)

    # ---- init the resident (8,128) partial-sum tile once per row block -----
    @pl.when(j == 0)
    def _init():
        out_ref[...] = jnp.zeros_like(out_ref)

    x_i = xi_ref[...]                                   # (TI, D_pad)  f32
    t_col = tcol_ref[...]                               # (TI, 1)      i32
    t_row = trow_ref[...]                               # (1, TJ)      i32
    sq_i = sqc_ref[...]                                 # (TI, 1)      f32
    sq_j = sqr_ref[...]                                 # (1, TJ)      f32

    r8 = lax.broadcasted_iota(jnp.int32, (8, 128), 0)
    c128 = lax.broadcasted_iota(jnp.int32, (8, 128), 1)

    # ---------------- embedding (contrastive) loss: block (i, j) ------------
    # xT column block -> native (TI,D)x(D,TJ) MXU contraction, no transpose.
    gram = jnp.dot(x_i, xtj_ref[...], preferred_element_type=jnp.float32)
    d2 = jnp.maximum((sq_i + sq_j) - 2.0 * gram, 0.0)   # (TI, TJ)
    d = jnp.sqrt(d2)

    sim = jnp.maximum(d - margin_s, 0.0)
    sim = sim * sim
    dis = jnp.maximum(margin_d - d, 0.0)
    dis = dis * dis
    per_pair = jnp.where(t_col == t_row, sim, dis)

    g_row = i * TI + lax.broadcasted_iota(jnp.int32, (TI, TJ), 0)
    g_col = j * TJ + lax.broadcasted_iota(jnp.int32, (TI, TJ), 1)
    # Mask the diagonal unconditionally (rounding can make d_ii > 0) and any
    # padded rows / columns.
    valid = (g_row != g_col) & (g_row < B) & (g_col < B)
    per_pair = jnp.where(valid, per_pair, 0.0)

    n_pairs = max(B * (B - 1), 1)
    emb_part = _sum_all(per_pair) * (lam / n_pairs)     # (1, 1)

    out_ref[...] += jnp.where((r8 == 0) & (c128 == 1), emb_part, 0.0)

    # ---------- classification: alpha * mean softmax CE (depends on i only) -
    @pl.when(j == 0)
    def _cls():
        d_pad = x_i.shape[1]
        col_d = lax.broadcasted_iota(jnp.int32, (TI, d_pad), 1)
        col_valid = col_d < D
        xm = jnp.where(col_valid, x_i, -1e30)           # padded cols -> -inf-ish
        m = jnp.max(xm, axis=1, keepdims=True)
        e = jnp.where(col_valid, jnp.exp(xm - m), 0.0)
        lse = jnp.log(jnp.sum(e, axis=1, keepdims=True)) + m
        tgt = jnp.sum(jnp.where(col_d == t_col, x_i, 0.0), axis=1, keepdims=True)
        ce = lse - tgt                                  # (TI, 1)
        r_idx = i * TI + lax.broadcasted_iota(jnp.int32, (TI, 1), 0)
        ce = jnp.where(r_idx < B, ce, 0.0)              # mask padded rows
        ce_part = _sum_all(ce) * (alpha / B)            # (1, 1)
        out_ref[...] += jnp.where((r8 == 0) & (c128 == 0), ce_part, 0.0)


def successive_e_c_loss(x, target, *, lam, alpha, margin_s, margin_d):
    """x: (B, C) float logits/embeddings; target: (B,) int class ids."""
    B, D = x.shape
    x = x.astype(jnp.float32)
    target = target.astype(jnp.int32)

    # Lane-dense padding: both the class/embedding dim and the pairwise lane
    # dim (columns of the distance matrix) go up to multiples of 128.
    D_pad = _round_up(max(D, 1), 128)
    B_pad = _round_up(max(B, 1), 128)

    # Tile sizes: TJ (lane dim of pairwise tiles / MXU N) 128 or 256,
    # TI (sublane dim / MXU M) 128, halved once so n_i >= 2 and v7x's second
    # TensorCore gets work even for small batches.
    TJ = 256 if (B_pad % 256 == 0) else 128
    TI = min(128, B_pad)
    # Keep the double-buffered input tiles comfortably under v7x's 64 MiB/TC.
    if TJ > 128 and 2 * (TI + TJ) * D_pad * 4 > 24 * 2**20:
        TJ = 128
    n_i = B_pad // TI
    if n_i == 1:
        TI = max(8, TI // 2)
        n_i = B_pad // TI
    n_j = B_pad // TJ

    if (B_pad != B) or (D_pad != D):
        x = jnp.pad(x, ((0, B_pad - B), (0, D_pad - D)))
    if B_pad != B:
        target = jnp.pad(target, (0, B_pad - B), constant_values=-1)

    # One-time wrapper-side transpose and row-norm precompute (hoisted out of
    # the kernel: no per-block XLU transpose, no per-block x*x temporary).
    xT = jnp.transpose(x)                   # (D_pad, B_pad)
    sq = jnp.sum(x * x, axis=1)             # (B_pad,)
    sq_col = sq.reshape(B_pad, 1)
    sq_row = sq.reshape(1, B_pad)
    t_col = target.reshape(B_pad, 1)
    t_row = target.reshape(1, B_pad)

    kernel = functools.partial(
        _successive_ec_kernel,
        lam=float(lam), alpha=float(alpha),
        margin_s=float(margin_s), margin_d=float(margin_d),
        B=B, D=D, TI=TI, TJ=TJ)

    # Generation-aware VMEM budget (~75% of per-core capacity as a ceiling).
    est_vmem = (2 * (TI * D_pad + D_pad * TJ) * 4        # double-buffered x / xT tiles
                + 8 * TI * TJ * 4                        # pairwise temporaries
                + 2 * 8 * 128 * 4                        # output tile
                + 8 * (TI + TJ) * 4)                     # target / norm vectors
    try:
        cap = int(pltpu.get_tpu_info().vmem_capacity_bytes)
    except Exception:  # pragma: no cover - conservative fallback
        cap = 64 * 2**20
    vmem_limit = int(min(max(2 * est_vmem, 32 * 2**20), int(0.75 * cap)))

    cost = pl.CostEstimate(
        flops=int(2 * B_pad * B_pad * D_pad           # gram matmuls
                  + 12 * B_pad * B_pad                # pairwise VPU work
                  + 8 * B_pad * D_pad),               # softmax VPU work
        transcendentals=int(B_pad * D_pad + B_pad + B_pad * B_pad),
        bytes_accessed=int((n_i + 1) * B_pad * D_pad * 4   # xT streamed per row block
                           + 16 * B_pad
                           + n_i * 8 * 128 * 4),
    )

    partials = pl.pallas_call(
        kernel,
        out_shape=jax.ShapeDtypeStruct((n_i * 8, 128), jnp.float32),
        grid=(n_i, n_j),
        in_specs=[
            pl.BlockSpec((TI, D_pad), lambda i, j: (i, 0)),   # x row block
            pl.BlockSpec((D_pad, TJ), lambda i, j: (0, j)),   # xT col block
            pl.BlockSpec((TI, 1),     lambda i, j: (i, 0)),   # target (col)
            pl.BlockSpec((1, TJ),     lambda i, j: (0, j)),   # target (row)
            pl.BlockSpec((TI, 1),     lambda i, j: (i, 0)),   # ||x||^2 (col)
            pl.BlockSpec((1, TJ),     lambda i, j: (0, j)),   # ||x||^2 (row)
        ],
        out_specs=pl.BlockSpec((8, 128), lambda i, j: (i, 0)),
        compiler_params=pltpu.CompilerParams(
            dimension_semantics=("parallel", "arbitrary"),
            vmem_limit_bytes=vmem_limit),
        cost_estimate=cost,
    )(x, xT, t_col, t_row, sq_col, sq_row)

    parts = jnp.sum(partials, axis=0)        # (128,) — only lanes 0,1 nonzero
    cls = parts[0]
    emb_w = parts[1]
    return cls + emb_w, emb_w, cls


def _reference(x, target, *, lam, alpha, margin_s, margin_d):
    """Pure-JAX reference of the same semantics (sanity check)."""
    B, D = x.shape
    logp = jax.nn.log_softmax(x, axis=1)
    ce = -jnp.take_along_axis(logp, target[:, None], axis=1)[:, 0]
    cls = alpha * jnp.mean(ce)

    d = jnp.sqrt(jnp.maximum(
        jnp.sum((x[:, None, :] - x[None, :, :]) ** 2, axis=-1), 0.0))
    same = (target[:, None] == target[None, :]).astype(jnp.float32)
    eye = jnp.eye(B, dtype=jnp.float32)
    per_pair = (same * jnp.maximum(d - margin_s, 0.0) ** 2
                + (1.0 - same) * jnp.maximum(margin_d - d, 0.0) ** 2) * (1.0 - eye)
    emb = jnp.sum(per_pair) / (B * (B - 1))
    return cls + lam * emb, lam * emb, cls


if __name__ == "__main__":
    key = jax.random.PRNGKey(0)
    kx, kt = jax.random.split(key)

    B, C = 8, 32                          # batch=8, num_classes/embedding_dim=32
    x = jax.random.normal(kx, (B, C), dtype=jnp.float32)
    target = jax.random.randint(kt, (B,), 0, 4).astype(jnp.int32)  # a few repeats

    lam, alpha, margin_s, margin_d = 0.5, 1.0, 0.2, 1.0

    succ, emb_w, cls = successive_e_c_loss(
        x, target, lam=lam, alpha=alpha, margin_s=margin_s, margin_d=margin_d)
    jax.block_until_ready((succ, emb_w, cls))

    r_succ, r_emb_w, r_cls = _reference(
        x, target, lam=lam, alpha=alpha, margin_s=margin_s, margin_d=margin_d)
    assert jnp.allclose(succ, r_succ, rtol=1e-4, atol=1e-5), (succ, r_succ)
    assert jnp.allclose(emb_w, r_emb_w, rtol=1e-4, atol=1e-5), (emb_w, r_emb_w)
    assert jnp.allclose(cls, r_cls, rtol=1e-4, atol=1e-5), (cls, r_cls)

    print("KERNEL_OK")
</pallas_src>

<mosaic_0001>
module attributes {stable_mosaic.version = 11 : i64} {
  func.func @_successive_ec_kernel(%arg0: i32, %arg1: i32, %arg2: memref<64x128xf32, #tpu.memory_space<vmem>>, %arg3: memref<128x128xf32, #tpu.memory_space<vmem>>, %arg4: memref<64x1xi32, #tpu.memory_space<vmem>>, %arg5: memref<1x128xi32, #tpu.memory_space<vmem>>, %arg6: memref<64x1xf32, #tpu.memory_space<vmem>>, %arg7: memref<1x128xf32, #tpu.memory_space<vmem>>, %arg8: memref<8x128xf32, #tpu.memory_space<vmem>>) attributes {dimension_semantics = [#tpu.dimension_semantics<parallel>, #tpu.dimension_semantics<arbitrary>], iteration_bounds = array<i64: 2, 1>, scalar_prefetch = 0 : i64, scratch_operands = 0 : i64, tpu.core_type = #tpu.core_type<tc>, window_params = [{transform_indices = @transform_0, window_bounds = array<i64: 64, 128>}, {transform_indices = @transform_1, window_bounds = array<i64: 128, 128>}, {transform_indices = @transform_2, window_bounds = array<i64: 64, 1>}, {transform_indices = @transform_3, window_bounds = array<i64: 1, 128>}, {transform_indices = @transform_4, window_bounds = array<i64: 64, 1>}, {transform_indices = @transform_5, window_bounds = array<i64: 1, 128>}, {transform_indices = @transform_6, window_bounds = array<i64: 8, 128>}]} {
    %c0_i32 = arith.constant 0 : i32
    %0 = arith.cmpi eq, %arg1, %c0_i32 : i32
    %1 = arith.extui %0 : i1 to i32
    %c0_i32_0 = arith.constant 0 : i32
    %2 = arith.cmpi ne, %1, %c0_i32_0 : i32
    scf.if %2 {
      %cst_31 = arith.constant 0.000000e+00 : f32
      %73 = vector.broadcast %cst_31 : f32 to vector<8x128xf32>
      %c0_32 = arith.constant 0 : index
      %c0_33 = arith.constant 0 : index
      %74 = vector.load %arg8[%c0_32, %c0_33] : memref<8x128xf32, #tpu.memory_space<vmem>>, vector<8x128xf32>
      tpu.vector_store %arg8[%c0_32, %c0_33], %73 {strides = array<i32>} : memref<8x128xf32, #tpu.memory_space<vmem>>, vector<8x128xf32>,
    } else {
    }
    %c0 = arith.constant 0 : index
    %c0_1 = arith.constant 0 : index
    %3 = vector.load %arg2[%c0, %c0_1] : memref<64x128xf32, #tpu.memory_space<vmem>>, vector<64x128xf32>
    %c0_2 = arith.constant 0 : index
    %c0_3 = arith.constant 0 : index
    %4 = vector.load %arg4[%c0_2, %c0_3] : memref<64x1xi32, #tpu.memory_space<vmem>>, vector<64x1xi32>
    %c0_4 = arith.constant 0 : index
    %c0_5 = arith.constant 0 : index
    %5 = vector.load %arg5[%c0_4, %c0_5] : memref<1x128xi32, #tpu.memory_space<vmem>>, vector<1x128xi32>
    %c0_6 = arith.constant 0 : index
    %c0_7 = arith.constant 0 : index
    %6 = vector.load %arg6[%c0_6, %c0_7] : memref<64x1xf32, #tpu.memory_space<vmem>>, vector<64x1xf32>
    %c0_8 = arith.constant 0 : index
    %c0_9 = arith.constant 0 : index
    %7 = vector.load %arg7[%c0_8, %c0_9] : memref<1x128xf32, #tpu.memory_space<vmem>>, vector<1x128xf32>
    %8 = tpu.iota {dimensions = array<i32: 0>} : vector<8x128xi32>
    %9 = tpu.iota {dimensions = array<i32: 1>} : vector<8x128xi32>
    %c0_10 = arith.constant 0 : index
    %c0_11 = arith.constant 0 : index
    %10 = vector.load %arg3[%c0_10, %c0_11] : memref<128x128xf32, #tpu.memory_space<vmem>>, vector<128x128xf32>
    %cst = arith.constant dense<0.000000e+00> : vector<64x128xf32>
    %11 = tpu.matmul %3, %10, %cst {dimension_numbers = #tpu.dot_dimension_numbers<[1], [0], [0], [1], [0, 0, 1, 1], [], []>} : vector<64x128xf32>, vector<128x128xf32>, vector<64x128xf32> -> vector<64x128xf32>
    %12 = vector.broadcast %6 : vector<64x1xf32> to vector<64x128xf32>
    %13 = vector.broadcast %7 : vector<1x128xf32> to vector<64x128xf32>
    %14 = arith.addf %12, %13 : vector<64x128xf32>
    %cst_12 = arith.constant 2.000000e+00 : f32
    %15 = vector.broadcast %cst_12 : f32 to vector<64x128xf32>
    %16 = arith.mulf %15, %11 : vector<64x128xf32>
    %17 = arith.subf %14, %16 : vector<64x128xf32>
    %cst_13 = arith.constant 0.000000e+00 : f32
    %18 = vector.broadcast %cst_13 : f32 to vector<64x128xf32>
    %19 = arith.maximumf %17, %18 : vector<64x128xf32>
    %20 = math.sqrt %19 : vector<64x128xf32>
    %cst_14 = arith.constant 2.000000e-01 : f32
    %21 = vector.broadcast %cst_14 : f32 to vector<64x128xf32>
    %22 = arith.subf %20, %21 : vector<64x128xf32>
    %cst_15 = arith.constant 0.000000e+00 : f32
    %23 = vector.broadcast %cst_15 : f32 to vector<64x128xf32>
    %24 = arith.maximumf %22, %23 : vector<64x128xf32>
    %25 = arith.mulf %24, %24 : vector<64x128xf32>
    %cst_16 = arith.constant 1.000000e+00 : f32
    %26 = vector.broadcast %cst_16 : f32 to vector<64x128xf32>
    %27 = arith.subf %26, %20 : vector<64x128xf32>
    %cst_17 = arith.constant 0.000000e+00 : f32
    %28 = vector.broadcast %cst_17 : f32 to vector<64x128xf32>
    %29 = arith.maximumf %27, %28 : vector<64x128xf32>
    %30 = arith.mulf %29, %29 : vector<64x128xf32>
    %31 = vector.broadcast %4 : vector<64x1xi32> to vector<64x128xi32>
    %32 = vector.broadcast %5 : vector<1x128xi32> to vector<64x128xi32>
    %33 = arith.cmpi eq, %31, %32 : vector<64x128xi32>
    %34 = arith.select %33, %25, %30 : vector<64x128xi1>, vector<64x128xf32>
    %c64_i32 = arith.constant 64 : i32
    %35 = arith.muli %arg0, %c64_i32 : i32
    %36 = tpu.iota {dimensions = array<i32: 0>} : vector<64x128xi32>
    %37 = vector.broadcast %35 : i32 to vector<64x128xi32>
    %38 = arith.addi %37, %36 : vector<64x128xi32>
    %c128_i32 = arith.constant 128 : i32
    %39 = arith.muli %arg1, %c128_i32 : i32
    %40 = tpu.iota {dimensions = array<i32: 1>} : vector<64x128xi32>
    %41 = vector.broadcast %39 : i32 to vector<64x128xi32>
    %42 = arith.addi %41, %40 : vector<64x128xi32>
    %43 = arith.cmpi ne, %38, %42 : vector<64x128xi32>
    %c8_i32 = arith.constant 8 : i32
    %44 = vector.broadcast %c8_i32 : i32 to vector<64x128xi32>
    %45 = arith.cmpi slt, %38, %44 : vector<64x128xi32>
    %46 = arith.andi %43, %45 : vector<64x128xi1>
    %c8_i32_18 = arith.constant 8 : i32
    %47 = vector.broadcast %c8_i32_18 : i32 to vector<64x128xi32>
    %48 = arith.cmpi slt, %42, %47 : vector<64x128xi32>
    %49 = arith.andi %46, %48 : vector<64x128xi1>
    %cst_19 = arith.constant 0.000000e+00 : f32
    %50 = vector.broadcast %cst_19 : f32 to vector<64x128xf32>
    %51 = arith.select %49, %34, %50 : vector<64x128xi1>, vector<64x128xf32>
    %cst_20 = arith.constant dense<0.000000e+00> : vector<64xf32>
    %52 = vector.multi_reduction <add>, %51, %cst_20 [1] : vector<64x128xf32> to vector<64xf32>
    %53 = vector.shape_cast %52 : vector<64xf32> to vector<64x1xf32>
    %cst_21 = arith.constant dense<0.000000e+00> : vector<1xf32>
    %54 = vector.multi_reduction <add>, %53, %cst_21 [0] : vector<64x1xf32> to vector<1xf32>
    %55 = vector.shape_cast %54 : vector<1xf32> to vector<1x1xf32>
    %cst_22 = arith.constant 0.00892857183 : f32
    %56 = vector.broadcast %cst_22 : f32 to vector<1x1xf32>
    %57 = arith.mulf %55, %56 : vector<1x1xf32>
    %c0_23 = arith.constant 0 : index
    %c0_24 = arith.constant 0 : index
    %58 = vector.load %arg8[%c0_23, %c0_24] : memref<8x128xf32, #tpu.memory_space<vmem>>, vector<8x128xf32>
    %c0_i32_25 = arith.constant 0 : i32
    %59 = vector.broadcast %c0_i32_25 : i32 to vector<8x128xi32>
    %60 = arith.cmpi eq, %8, %59 : vector<8x128xi32>
    %c1_i32 = arith.constant 1 : i32
    %61 = vector.broadcast %c1_i32 : i32 to vector<8x128xi32>
    %62 = arith.cmpi eq, %9, %61 : vector<8x128xi32>
    %63 = arith.andi %60, %62 : vector<8x128xi1>
    %cst_26 = arith.constant 0.000000e+00 : f32
    %64 = vector.shape_cast %57 : vector<1x1xf32> to vector<1x1xf32>
    %65 = vector.broadcast %64 : vector<1x1xf32> to vector<8x128xf32>
    %66 = vector.broadcast %cst_26 : f32 to vector<8x128xf32>
    %67 = arith.select %63, %65, %66 : vector<8x128xi1>, vector<8x128xf32>
    %68 = arith.addf %58, %67 : vector<8x128xf32>
    %c0_27 = arith.constant 0 : index
    %c0_28 = arith.constant 0 : index
    %69 = vector.load %arg8[%c0_27, %c0_28] : memref<8x128xf32, #tpu.memory_space<vmem>>, vector<8x128xf32>
    tpu.vector_store %arg8[%c0_27, %c0_28], %68 {strides = array<i32>} : memref<8x128xf32, #tpu.memory_space<vmem>>, vector<8x128xf32>,
    %c0_i32_29 = arith.constant 0 : i32
    %70 = arith.cmpi eq, %arg1, %c0_i32_29 : i32
    %71 = arith.extui %70 : i1 to i32
    %c0_i32_30 = arith.constant 0 : i32
    %72 = arith.cmpi ne, %71, %c0_i32_30 : i32
    scf.if %72 {
      %73 = tpu.iota {dimensions = array<i32: 1>} : vector<64x128xi32>
      %c32_i32 = arith.constant 32 : i32
      %74 = vector.broadcast %c32_i32 : i32 to vector<64x128xi32>
      %75 = arith.cmpi slt, %73, %74 : vector<64x128xi32>
      %cst_31 = arith.constant -1.000000e+30 : f32
      %76 = vector.broadcast %cst_31 : f32 to vector<64x128xf32>
      %77 = arith.select %75, %3, %76 : vector<64x128xi1>, vector<64x128xf32>
      %cst_32 = arith.constant dense<0xFF800000> : vector<64xf32>
      %78 = vector.multi_reduction <maximumf>, %77, %cst_32 [1] : vector<64x128xf32> to vector<64xf32>
      %79 = vector.shape_cast %78 : vector<64xf32> to vector<64x1xf32>
      %80 = vector.broadcast %79 : vector<64x1xf32> to vector<64x128xf32>
      %81 = arith.subf %77, %80 : vector<64x128xf32>
      %82 = math.exp %81 : vector<64x128xf32>
      %cst_33 = arith.constant 0.000000e+00 : f32
      %83 = vector.broadcast %cst_33 : f32 to vector<64x128xf32>
      %84 = arith.select %75, %82, %83 : vector<64x128xi1>, vector<64x128xf32>
      %cst_34 = arith.constant dense<0.000000e+00> : vector<64xf32>
      %85 = vector.multi_reduction <add>, %84, %cst_34 [1] : vector<64x128xf32> to vector<64xf32>
      %86 = vector.shape_cast %85 : vector<64xf32> to vector<64x1xf32>
      %87 = math.log %86 : vector<64x1xf32>
      %88 = arith.addf %87, %79 : vector<64x1xf32>
      %89 = vector.broadcast %4 : vector<64x1xi32> to vector<64x128xi32>
      %90 = arith.cmpi eq, %73, %89 : vector<64x128xi32>
      %cst_35 = arith.constant 0.000000e+00 : f32
      %91 = vector.broadcast %cst_35 : f32 to vector<64x128xf32>
      %92 = arith.select %90, %3, %91 : vector<64x128xi1>, vector<64x128xf32>
      %cst_36 = arith.constant dense<0.000000e+00> : vector<64xf32>
      %93 = vector.multi_reduction <add>, %92, %cst_36 [1] : vector<64x128xf32> to vector<64xf32>
      %94 = vector.shape_cast %93 : vector<64xf32> to vector<64x1xf32>
      %95 = arith.subf %88, %94 : vector<64x1xf32>
      %c64_i32_37 = arith.constant 64 : i32
      %96 = arith.muli %arg0, %c64_i32_37 : i32
      %97 = tpu.iota {dimensions = array<i32: 0>} : vector<64x1xi32>
      %98 = vector.broadcast %96 : i32 to vector<64x1xi32>
      %99 = arith.addi %98, %97 : vector<64x1xi32>
      %c8_i32_38 = arith.constant 8 : i32
      %100 = vector.broadcast %c8_i32_38 : i32 to vector<64x1xi32>
      %101 = arith.cmpi slt, %99, %100 : vector<64x1xi32>
      %cst_39 = arith.constant 0.000000e+00 : f32
      %102 = vector.broadcast %cst_39 : f32 to vector<64x1xf32>
      %103 = arith.select %101, %95, %102 : vector<64x1xi1>, vector<64x1xf32>
      %cst_40 = arith.constant dense<0.000000e+00> : vector<64xf32>
      %104 = vector.multi_reduction <add>, %103, %cst_40 [1] : vector<64x1xf32> to vector<64xf32>
      %105 = vector.shape_cast %104 : vector<64xf32> to vector<64x1xf32>
      %cst_41 = arith.constant dense<0.000000e+00> : vector<1xf32>
      %106 = vector.multi_reduction <add>, %105, %cst_41 [0] : vector<64x1xf32> to vector<1xf32>
      %107 = vector.shape_cast %106 : vector<1xf32> to vector<1x1xf32>
      %cst_42 = arith.constant 1.250000e-01 : f32
      %108 = vector.broadcast %cst_42 : f32 to vector<1x1xf32>
      %109 = arith.mulf %107, %108 : vector<1x1xf32>
      %c0_43 = arith.constant 0 : index
      %c0_44 = arith.constant 0 : index
      %110 = vector.load %arg8[%c0_43, %c0_44] : memref<8x128xf32, #tpu.memory_space<vmem>>, vector<8x128xf32>
      %c0_i32_45 = arith.constant 0 : i32
      %111 = vector.broadcast %c0_i32_45 : i32 to vector<8x128xi32>
      %112 = arith.cmpi eq, %8, %111 : vector<8x128xi32>
      %c0_i32_46 = arith.constant 0 : i32
      %113 = vector.broadcast %c0_i32_46 : i32 to vector<8x128xi32>
      %114 = arith.cmpi eq, %9, %113 : vector<8x128xi32>
      %115 = arith.andi %112, %114 : vector<8x128xi1>
      %cst_47 = arith.constant 0.000000e+00 : f32
      %116 = vector.shape_cast %109 : vector<1x1xf32> to vector<1x1xf32>
      %117 = vector.broadcast %116 : vector<1x1xf32> to vector<8x128xf32>
      %118 = vector.broadcast %cst_47 : f32 to vector<8x128xf32>
      %119 = arith.select %115, %117, %118 : vector<8x128xi1>, vector<8x128xf32>
      %120 = arith.addf %110, %119 : vector<8x128xf32>
      %c0_48 = arith.constant 0 : index
      %c0_49 = arith.constant 0 : index
      %121 = vector.load %arg8[%c0_48, %c0_49] : memref<8x128xf32, #tpu.memory_space<vmem>>, vector<8x128xf32>
      tpu.vector_store %arg8[%c0_48, %c0_49], %120 {strides = array<i32>} : memref<8x128xf32, #tpu.memory_space<vmem>>, vector<8x128xf32>,
    } else {
    }
    return
  }
  func.func @transform_0(%arg0: i32, %arg1: i32) -> (i32, i32) {
    %c0_i32 = arith.constant 0 : i32
    %c0_i32_0 = arith.constant 0 : i32
    return %arg0, %c0_i32 : i32, i32
  }
  func.func @transform_1(%arg0: i32, %arg1: i32) -> (i32, i32) {
    %c0_i32 = arith.constant 0 : i32
    %c0_i32_0 = arith.constant 0 : i32
    return %c0_i32, %arg1 : i32, i32
  }
  func.func @transform_2(%arg0: i32, %arg1: i32) -> (i32, i32) {
    %c0_i32 = arith.constant 0 : i32
    %c0_i32_0 = arith.constant 0 : i32
    return %arg0, %c0_i32 : i32, i32
  }
  func.func @transform_3(%arg0: i32, %arg1: i32) -> (i32, i32) {
    %c0_i32 = arith.constant 0 : i32
    %c0_i32_0 = arith.constant 0 : i32
    return %c0_i32, %arg1 : i32, i32
  }
  func.func @transform_4(%arg0: i32, %arg1: i32) -> (i32, i32) {
    %c0_i32 = arith.constant 0 : i32
    %c0_i32_0 = arith.constant 0 : i32
    return %arg0, %c0_i32 : i32, i32
  }
  func.func @transform_5(%arg0: i32, %arg1: i32) -> (i32, i32) {
    %c0_i32 = arith.constant 0 : i32
    %c0_i32_0 = arith.constant 0 : i32
    return %c0_i32, %arg1 : i32, i32
  }
  func.func @transform_6(%arg0: i32, %arg1: i32) -> (i32, i32) {
    %c0_i32 = arith.constant 0 : i32
    %c0_i32_0 = arith.constant 0 : i32
    return %arg0, %c0_i32 : i32, i32
  }
}

</mosaic_0001>

<bundles_post_ra>
// kernel: tpu_custom_call.1
= control target key start
LH: loop header
LB: loop body
LE: loop exit
PB: predicated region body
PF: predicated region fallthrough
CT: control target
= control target key end

     0   :  { %11 = vsyncpa [#allocation3], 0  ;;  %s2109_s0 = inlined_call_operand.vmem [shape: f32[128,128], index: 0, kind: input, shape index: {}]   ;;  %s2110_s1 = inlined_call_operand.vmem [shape: f32[128,128], index: 1, kind: input, shape index: {}]   ;;  %s2111_s2 = inlined_call_operand.vmem [shape: s32[128,1], index: 2, kind: input, shape index: {}]   ;;  %s2112_s3 = inlined_call_operand.vmem [shape: s32[1,128], index: 3, kind: input, shape index: {}]   ;;  %s2113_s4 = inlined_call_operand.vmem [shape: f32[128,1], index: 4, kind: input, shape index: {}]   ;;  %s2114_s5 = inlined_call_operand.vmem [shape: f32[1,128], index: 5, kind: input, shape index: {}]   ;;  %s2115_s6 = inlined_call_operand.hbm [shape: f32[16,128], index: 6, kind: output, shape index: {}]  }
   0x1   :  { %13 = vsyncpa [#allocation3 + $0x1], 0  ;;  %s1427_s21 = smov 0   ;;  %s1429_s22 = smov 0  }
   0x2   :  { %s1431_s23 = smov 0   ;;  %s1433_s24 = smov 0  }
   0x3   :  { %s1435_s25 = smov 0   ;;  %s1437_s26 = smov 0  }
   0x4 LB: > { %s1125_s27 = sadd.s32 4294967295, %s1389_s26   ;;  %s1126_s28 = sadd.s32 4294967294, %s1389_s26   ;;  %s1389_s26 = sphi %s1437_s26, %s19_s26   ;;  %s1385_s25 = sphi %s1435_s25, %s2139_s25   ;;  %s1381_s24 = sphi %s1433_s24, %s2138_s24   ;;  %s1377_s23 = sphi %s1431_s23, %s2137_s23   ;;  %s1373_s22 = sphi %s1429_s22, %s2136_s22   ;;  %s1369_s21 = sphi %s1427_s21, %s2135_s21  }
   0x5   : > { %s31_s29 = sadd.s32 1, %s1385_s25  ;;  %s194_s30 = sadd.s32 1, %s1377_s23 }
   0x6   : > { %p33_p0 = scmp.ge.s32.totalorder %s31_s29, 2  ;;  %p204_p1 = scmp.ne.s32.totalorder %s1377_s23, %s1373_s22 }
   0x7   : > { %p205_p2 = scmp.eq.s32.totalorder %s1125_s27, 1  ;;  %p210_p3 = scmp.ne.s32.totalorder %s1373_s22, %s1369_s21 }
   0x8   : > { %s2141_s29 = smov (%p33_p0, %s31_s29), 0  ;;  %p211_p5 = scmp.eq.s32.totalorder %s1126_s28, 1 }
   0x9   : > { %p1467_p4 = por %p205_p2, %p204_p1  ;;  %s191_s8 = ssub.s32 %s1385_s25, %s2141_s29 }
   0xa   : > { %p1132_p6 = scmp.ge.s32.totalorder %s1389_s26, 1  ;;  %p192_p7 = scmp.eq.s32.totalorder %s191_s8, 0 }
   0xb   : > { %p1474_p8 = por %p211_p5, %p210_p3  ;;  %p275_p9 = scmp.lt.s32.totalorder %s1389_s26, 3 }
   0xc   : > { %s1480_s10 = scalar_select %p192_p7, %s1377_s23, %s194_s30  }
   0xd   : > { %p276_p10 = pnand %p1132_p6, %p275_p9 }
   0xe   : > { %s1489_s15 = sshll.u32 (!%p276_p10), %s1381_s24, 3  ;;  %s1148_s20 = sshll.u32 (!%p276_p10), %s1381_s24, 6 }
   0xf   : > { %279 = sbr.rel (%p276_p10) target bundleno = 408 (0x198), region = 44  ;;  %p326_p11 = scmp.lt.s32.totalorder (!%p276_p10), %s1489_s15, 15 }
  0x10   : > { %s322_s30 = sand.u32 (!%p276_p10), 1, %s1373_s22   ;;  %s990_s14 = scalar_lea.hbm (!%p276_p10), %s2115_s6, %s1489_s15 }
  0x11   : > { %s1133_s8 = sshll.u32 (!%p276_p10), %s322_s30, 3  ;;  %s994_s17 = sshll.u32 (!%p276_p10), %s990_s14, 4  ;;  %s995_s17 = int_to_ptr.hbm [resolvable:$true] %s994_s17 }
  0x12   : > { %s1331_s24 = scalar_lea.hbm (!%p276_p10), %s2115_s6, 16 }
  0x14   : > { %v403_v0 = vld [vmem:[%s2110_s1 + $0x78] sm:$0xff]  ;;  %v402_v1 = vld [vmem:[%s2110_s1 + $0x70] sm:$0xff]  ;;  %v384_v2 = vlaneseq  ;;  %v401_v3 = vld [vmem:[%s2110_s1 + $0x68] sm:$0xff]  ;;  %s327_s18 = scalar_select %p326_p11, %s1489_s15, 15  ;;  %v1391_v35 = vmov 0  }
  0x15   : > { %404 = vmatpush.msra.mxu0 %v403_v0  ;;  %1153 = vmatpush.msra.mxu1 %v403_v0  ;;  %v400_v5 = vld [vmem:[%s2110_s1 + $0x60] sm:$0xff]  ;;  %v399_v6 = vld [vmem:[%s2110_s1 + $0x58] sm:$0xff]  ;;  %v398_v13 = vld [vmem:[%s2110_s1 + $0x50] sm:$0xff] }
  0x16   : > { %1154 = vmatpush.msra.mxu2 %v403_v0  ;;  %1155 = vmatpush.msra.mxu3 %v403_v0  ;;  %v1496_v4 = vand.u32 127, %v384_v2  ;;  %s1502_s27 = sshll.u32 %s327_s18, 3  ;;  %v397_v14 = vld [vmem:[%s2110_s1 + $0x48] sm:$0xff]  ;;  %v396_v15 = vld [vmem:[%s2110_s1 + $0x40] sm:$0xff]  ;;  %v395_v18 = vld [vmem:[%s2110_s1 + $0x38] sm:$0xff] }
  0x17   : > { %405 = vmatpush.msra.mxu0 %v402_v1  ;;  %1156 = vmatpush.msra.mxu1 %v402_v1  ;;  %s1512_s12 = scalar_lea.vmem %s2109_s0, %s1502_s27  ;;  %v394_v23 = vld [vmem:[%s2110_s1 + $0x30] sm:$0xff]  ;;  %v393_v24 = vld [vmem:[%s2110_s1 + $0x28] sm:$0xff]  ;;  %v392_v25 = vld [vmem:[%s2110_s1 + $0x20] sm:$0xff]  ;;  %s1617_s16 = scalar_lea.vmem %s2113_s4, %s1502_s27 }
  0x18   : > { %1157 = vmatpush.msra.mxu2 %v402_v1  ;;  %1158 = vmatpush.msra.mxu3 %v402_v1  ;;  %vm806_vm0 = vcmp.lt.s32.totalorder %v1496_v4, 32  ;;  %v1515_v7 = vld [vmem:[%s1512_s12 + $0x10] sm:$0xff]  ;;  %v1518_v8 = vld [vmem:[%s1512_s12 + $0x8] sm:$0xff]  ;;  %v1521_v9 = vld [vmem:[%s1512_s12] sm:$0xff]  ;;  %s339_s18 = scalar_lea.vmem %s2111_s2, %s1502_s27  ;;  %vm749_vm7 = vcmp.lt.s32.totalorder %v1496_v4, 8  ;;  %s1325_s27 = sshra.s32 %s995_s17, 4  ;;  %s1326_s27 = int_to_ptr.hbm [resolvable:$true] %s1325_s27 }
  0x19   : > { %406 = vmatpush.msra.mxu0 %v401_v3  ;;  %1159 = vmatpush.msra.mxu1 %v401_v3  ;;  %v1526_v10 = vsel %vm806_vm0, %v1515_v7, -1e+30  ;;  %v1531_v11 = vsel %vm806_vm0, %v1518_v8, -1e+30  ;;  %v1536_v12 = vsel %vm806_vm0, %v1521_v9, -1e+30  ;;  %p1332_p1 = scmp.lt.s32.totalorder %s1326_s27, %s2115_s6 }
  0x1a   : > { %1160 = vmatpush.msra.mxu2 %v401_v3  ;;  %1161 = vmatpush.msra.mxu3 %v401_v3  ;;  %v1551_v16 = vld [vmem:[%s1512_s12 + $0x30] sm:$0xff]  ;;  %v1554_v17 = vld [vmem:[%s1512_s12 + $0x28] sm:$0xff]  ;;  %v1560_v19 = vld [vmem:[%s1512_s12 + $0x18] sm:$0xff]  ;;  %s1327_s19 = scalar_lea.hbm %s1326_s27, 8 }
  0x1b   : > { %407 = vmatpush.msra.mxu0 %v400_v5  ;;  %1162 = vmatpush.msra.mxu1 %v400_v5  ;;  %v1565_v20 = vsel %vm806_vm0, %v1551_v16, -1e+30  ;;  %v1570_v21 = vsel %vm806_vm0, %v1554_v17, -1e+30  ;;  %v1575_v22 = vsel %vm806_vm0, %v1560_v19, -1e+30  ;;  %p1328_p12 = scmp.ne.s32.totalorder %s1326_s27, %s1327_s19  ;;  %p1333_p2 = scmp.lt.s32.totalorder %s1331_s24, %s1327_s19 }
  0x1c   : > { %1163 = vmatpush.msra.mxu2 %v400_v5  ;;  %1164 = vmatpush.msra.mxu3 %v400_v5  ;;  %v1590_v26 = vld [vmem:[%s1512_s12 + $0x20] sm:$0xff]  ;;  %v391_v27 = vld [vmem:[%s2110_s1 + $0x18] sm:$0xff]  ;;  %v390_v29 = vld [vmem:[%s2110_s1 + $0x10] sm:$0xff] }
  0x1d   : > { %408 = vmatpush.msra.mxu0 %v399_v6  ;;  %1165 = vmatpush.msra.mxu1 %v399_v6  ;;  %v1598_v28 = vsel %vm806_vm0, %v1590_v26, -1e+30  ;;  %v389_v30 = vld [vmem:[%s2110_s1 + $0x8] sm:$0xff]  ;;  %v388_v31 = vld [vmem:[%s2110_s1] sm:$0xff]  ;;  %v1611_v32 = vld [vmem:[%s1512_s12 + $0x38] sm:$0xff]  ;;  %p1329_p13 = pnand %p1328_p12, %p1467_p4  ;;  %p1334_p3 = por %p1333_p2, %p1332_p1 }
  0x1e   : > { %1166 = vmatpush.msra.mxu2 %v399_v6  ;;  %819 = vmax.xlane.f32.xlu1 %v1526_v10  ;;  %v1622_v33 = vsel %vm806_vm0, %v1611_v32, -1e+30  ;;  %v375_v34 = vld [vmem:[%s1617_s16] sm:$0xff]  ;;  %v377_v36 = vld [vmem:[%s1617_s16 + $0x10] sm:$0xff]  ;;  %v376_v37 = vld [vmem:[%s1617_s16 + $0x8] sm:$0xff] }
  0x1f   : > { %817 = vmax.xlane.f32.xlu0 %v1531_v11  ;;  %815 = vmax.xlane.f32.xlu2 %v1536_v12  ;;  %v378_v38 = vld [vmem:[%s1617_s16 + $0x18] sm:$0xff]  ;;  %v381_v39 = vld [vmem:[%s1617_s16 + $0x30] sm:$0xff]  ;;  %v379_v40 = vld [vmem:[%s1617_s16 + $0x20] sm:$0xff]  ;;  %p1330_p0 = pneg %p1329_p13 }
  0x20   : > { %1167 = vmatpush.msra.mxu3 %v399_v6  ;;  %409 = vmatpush.msra.mxu0 %v398_v13  ;;  %v382_v41 = vld [vmem:[%s1617_s16 + $0x38] sm:$0xff]  ;;  %v367_v42 = vld [vmem:[%s339_s18 + $0x8] sm:$0xff]  ;;  %v368_v44 = vld [vmem:[%s339_s18 + $0x10] sm:$0xff] }
  0x21   : > { %1168 = vmatpush.msra.mxu1 %v398_v13  ;;  %1169 = vmatpush.msra.mxu2 %v398_v13  ;;  %v380_v43 = vld [vmem:[%s1617_s16 + $0x28] sm:$0xff]  ;;  %v369_v45 = vld [vmem:[%s339_s18 + $0x18] sm:$0xff]  ;;  %v366_v46 = vld [vmem:[%s339_s18] sm:$0xff]  ;;  %s324_s16 = scalar_lea.vmem [#allocation2], %s1133_s8  ;;  %p1335_p5 = pnand %p1334_p3, %p1330_p0 }
  0x22   : > { %1170 = vmatpush.msra.mxu3 %v398_v13  ;;  %410 = vmatpush.msra.mxu0 %v397_v14  ;;  %v370_v47 = vld [vmem:[%s339_s18 + $0x20] sm:$0xff]  ;;  %v372_v48 = vld [vmem:[%s339_s18 + $0x30] sm:$0xff]  ;;  %v371_v49 = vld [vmem:[%s339_s18 + $0x28] sm:$0xff]  ;;  %s992_s12 = sshll.u32 %s324_s16, 4  ;;  %s993_s12 = int_to_ptr.vmem [resolvable:$true] %s992_s12 }
  0x23   : > { %1171 = vmatpush.msra.mxu1 %v397_v14  ;;  %1172 = vmatpush.msra.mxu2 %v397_v14  ;;  %v373_v50 = vld [vmem:[%s339_s18 + $0x38] sm:$0xff]  ;;  %s980_s18 = scalar_lea.sflag [#allocation3], %s322_s30 }
  0x24   : > { %1173 = vmatpush.msra.mxu3 %v397_v14  ;;  %411 = vmatpush.msra.mxu0 %v396_v15 }
  0x25   : > { %1174 = vmatpush.msra.mxu1 %v396_v15  ;;  %1175 = vmatpush.msra.mxu2 %v396_v15 }
  0x26   : > { %1176 = vmatpush.msra.mxu3 %v396_v15  ;;  %412 = vmatpush.msra.mxu0 %v395_v18 }
  0x27   : > { %1177 = vmatpush.msra.mxu1 %v395_v18  ;;  %1178 = vmatpush.msra.mxu2 %v395_v18 }
  0x28   : > { %827 = vmax.xlane.f32.xlu1 %v1565_v20  ;;  %825 = vmax.xlane.f32.xlu0 %v1570_v21 }
  0x29   : > { %821 = vmax.xlane.f32.xlu2 %v1575_v22  ;;  %1179 = vmatpush.msra.mxu3 %v395_v18 }
  0x2a   : > { %413 = vmatpush.msra.mxu0 %v394_v23  ;;  %1180 = vmatpush.msra.mxu1 %v394_v23 }
  0x2b   : > { %1181 = vmatpush.msra.mxu2 %v394_v23  ;;  %1182 = vmatpush.msra.mxu3 %v394_v23 }
  0x2c   : > { %414 = vmatpush.msra.mxu0 %v393_v24  ;;  %1183 = vmatpush.msra.mxu1 %v393_v24 }
  0x2d   : > { %1184 = vmatpush.msra.mxu2 %v393_v24  ;;  %1185 = vmatpush.msra.mxu3 %v393_v24 }
  0x2e   : > { %415 = vmatpush.msra.mxu0 %v392_v25  ;;  %1186 = vmatpush.msra.mxu1 %v392_v25 }
  0x2f   : > { %1187 = vmatpush.msra.mxu2 %v392_v25  ;;  %1188 = vmatpush.msra.mxu3 %v392_v25 }
  0x30   : > { %416 = vmatpush.msra.mxu0 %v391_v27  ;;  %1189 = vmatpush.msra.mxu1 %v391_v27 }
  0x31   : > { %1190 = vmatpush.msra.mxu2 %v391_v27  ;;  %823 = vmax.xlane.f32.xlu2 %v1598_v28 }
  0x32   : > { %1191 = vmatpush.msra.mxu3 %v391_v27  ;;  %417 = vmatpush.msra.mxu0 %v390_v29 }
  0x33   : > { %1192 = vmatpush.msra.mxu1 %v390_v29  ;;  %1193 = vmatpush.msra.mxu2 %v390_v29 }
  0x34   : > { %1194 = vmatpush.msra.mxu3 %v390_v29  ;;  %418 = vmatpush.msra.mxu0 %v389_v30 }
  0x35   : > { %1195 = vmatpush.msra.mxu1 %v389_v30  ;;  %1196 = vmatpush.msra.mxu2 %v389_v30 }
  0x36   : > { %1197 = vmatpush.msra.mxu3 %v389_v30  ;;  %419 = vmatpush.msra.mxu0 %v388_v31 }
  0x37   : > { %1198 = vmatpush.msra.mxu1 %v388_v31  ;;  %1199 = vmatpush.msra.mxu2 %v388_v31 }
  0x38   : > { %1200 = vmatpush.msra.mxu3 %v388_v31  ;;  %420 = vmatmul.f32.vlgmr.msra.gmra.mxu0 %v1521_v9 }
  0x39   : > { %426 = vmatmul.f32.vlgmr.msra.gmra.mxu1 %v1515_v7  ;;  %432 = vmatmul.f32.vlgmr.msra.gmra.mxu2 %v1590_v26 }
  0x3a   : > { %438 = vmatmul.f32.vlgmr.msra.gmra.mxu3 %v1551_v16  ;;  %829 = vmax.xlane.f32.xlu2 %v1622_v33 }
  0x3b   : > { %1258 = vset.pattern.permute.xlu0 %v1391_v35  ;;  %1259 = vset.pattern.permute.xlu1 %v1391_v35 }
  0x3c   : > { %447 = vperm.xlu0 %1258, %v375_v34   ;;  %1260 = vset.pattern.permute.xlu2 %v1391_v35  ;;  %v1261_v35 = vld [vmem:[%s2114_s5] ss:$0 sm:$0xff] }
  0x40   : > { %423 = vmatmul.f32.gmra.mxu0 %v1518_v8 }
  0x41   : > { %429 = vmatmul.f32.gmra.mxu1 %v1560_v19  ;;  %435 = vmatmul.f32.gmra.mxu2 %v1554_v17 }
  0x42   : > { %441 = vmatmul.f32.gmra.mxu3 %v1611_v32  ;;  %457 = vperm.xlu1 %1259, %v377_v36  }
  0x44   : > { %452 = vperm.xlu0 %1258, %v376_v37  }
  0x4a   : > { %462 = vperm.xlu1 %1259, %v378_v38  }
  0x4c   : > { %477 = vperm.xlu0 %1258, %v381_v39  }
  0x52   : > { %467 = vperm.xlu2 %1260, %v379_v40   ;;  %482 = vperm.xlu1 %1259, %v382_v41  }
  0x54   : > { %668 = vperm.xlu0 %1258, %v367_v42  }
  0x5a   : > { %472 = vperm.xlu2 %1260, %v380_v43   ;;  %671 = vperm.xlu1 %1259, %v368_v44  }
  0x5c   : > { %674 = vperm.xlu0 %1258, %v369_v45  }
  0x62   : > { %665 = vperm.xlu2 %1260, %v366_v46   ;;  %677 = vperm.xlu1 %1259, %v370_v47  }
  0x64   : > { %683 = vperm.xlu0 %1258, %v372_v48  }
  0x6a   : > { %680 = vperm.xlu2 %1260, %v371_v49   ;;  %686 = vperm.xlu1 %1259, %v373_v50  }
  0x91   : > { %v1645_v51 = vpop.xlane.xlu1 %819 }
  0x92   : > { %v833_v52 = vsub.f32 %v1526_v10, %v1645_v51  ;;  %v1649_v53 = vpop.xlane.xlu0 %817  ;;  %v1651_v54 = vpop.xlane.xlu2 %815 }
  0x93   : > { %v832_v55 = vsub.f32 %v1531_v11, %v1649_v53  ;;  %v831_v56 = vsub.f32 %v1536_v12, %v1651_v54 }
  0x94   : > { %v843_v57 = vmul.f32 1.442695, %v833_v52 }
  0x95   : > { %v841_v58 = vmul.f32 1.442695, %v832_v55  ;;  %v839_v59 = vmul.f32 1.442695, %v831_v56 }
  0x96   : > { %1263 = vpow2.f32 %v843_v57 }
  0x97   : > { %1265 = vpow2.f32 %v841_v58 }
  0x98   : > { %1267 = vpow2.f32 %v839_v59 }
  0x9b   : > { %v1657_v60 = vpop.xlane.xlu0 %825  ;;  %v1659_v61 = vpop.xlane.xlu1 %827 }
  0x9c   : > { %v1264_v62 = vpop.eup %1263  ;;  %v836_v63 = vsub.f32 %v1570_v21, %v1657_v60  ;;  %v1663_v0 = vpop.xlane.xlu2 %821  ;;  %v837_v6 = vsub.f32 %v1565_v20, %v1659_v61 }
  0x9d   : > { %v1266_v1 = vpop.eup %1265  ;;  %v834_v3 = vsub.f32 %v1575_v22, %v1663_v0  ;;  %v857_v5 = vsel %vm806_vm0, %v1264_v62, 0.0 }
  0x9e   : > { %v1268_v10 = vpop.eup %1267  ;;  %v849_v11 = vmul.f32 1.442695, %v836_v63  ;;  %867 = vadd.xlane.f32.xlu1 %v857_v5  ;;  %v856_v12 = vsel %vm806_vm0, %v1266_v1, 0.0  ;;  %v851_v15 = vmul.f32 1.442695, %v837_v6  ;;  %v1701_v1 = vshrl.u32 %v384_v2, 7 }
  0x9f   : > { %v845_v13 = vmul.f32 1.442695, %v834_v3  ;;  %865 = vadd.xlane.f32.xlu2 %v856_v12  ;;  %v855_v14 = vsel %vm806_vm0, %v1268_v10, 0.0  ;;  %v1704_v12 = vstv %s1148_s20 }
  0xa0   : > { %1269 = vpow2.f32 %v849_v11  ;;  %863 = vadd.xlane.f32.xlu0 %v855_v14  ;;  %v707_v2 = vadd.s32 16, %v1701_v1 }
  0xa1   : > { %1271 = vpow2.f32 %v845_v13 }
  0xa2   : > { %1273 = vpow2.f32 %v851_v15 }
  0xa4   : > { %v1675_v18 = vpop.xlane.xlu2 %823 }
  0xa5   : > { %v835_v20 = vsub.f32 %v1598_v28, %v1675_v18 }
  0xa6   : > { %v1270_v21 = vpop.eup %1269 }
  0xa7   : > { %v1272_v22 = vpop.eup %1271  ;;  %v847_v23 = vmul.f32 1.442695, %v835_v20  ;;  %v860_v24 = vsel %vm806_vm0, %v1270_v21, 0.0 }
  0xa8   : > { %873 = vadd.xlane.f32.xlu0 %v860_v24  ;;  %v858_v25 = vsel %vm806_vm0, %v1272_v22, 0.0  ;;  %v1274_v27 = vpop.eup %1273 }
  0xa9   : > { %1275 = vpow2.f32 %v847_v23  ;;  %869 = vadd.xlane.f32.xlu1 %v858_v25  ;;  %v861_v31 = vsel %vm806_vm0, %v1274_v27, 0.0  ;;  %v1715_v27 = vadd.s32 %v1704_v12, %v1701_v1 }
  0xab   : > { %vm725_vm2 = vcmp.ne.s32.totalorder %v1715_v27, %v1496_v4  ;;  %vm2116_vm3 = vcmp.lt.s32.totalorder %v1715_v27, 8 }
  0xad   : > { %v1683_v29 = vpop.xlane.xlu2 %829 }
  0xae   : > { %v448_v30 = vpop.permute.xlu0 %447  ;;  %v838_v36 = vsub.f32 %v1622_v33, %v1683_v29 }
  0xaf   : > { %v1276_v28 = vpop.eup %1275  ;;  %v488_v41 = vadd.f32 %v1261_v35, %v448_v30 }
  0xb0   : > { %v859_v34 = vsel %vm806_vm0, %v1276_v28, 0.0  ;;  %v853_v45 = vmul.f32 1.442695, %v838_v36 }
  0xb1   : > { %875 = vadd.xlane.f32.xlu1 %v861_v31  ;;  %871 = vadd.xlane.f32.xlu2 %v859_v34 }
  0xb2   : > { %1277 = vpow2.f32 %v853_v45 }
  0xb4   : > { %v458_v37 = vpop.permute.xlu1 %457 }
  0xb5   : > { %v490_v38 = vadd.f32 %v1261_v35, %v458_v37  ;;  %v468_v39 = vpop.permute.xlu2 %467  ;;  %v421_v40 = vpop.f32.mrf.mxu0  ;;  %v709_v37 = vadd.s32 32, %v1701_v1 }
  0xb6   : > { %v496_v42 = vmul.f32 2.0, %v421_v40  ;;  %v427_v43 = vpop.f32.mrf.mxu1  ;;  %v453_v44 = vpop.permute.xlu0 %452  ;;  %v492_v50 = vadd.f32 %v1261_v35, %v468_v39 }
  0xb7   : > { %v498_v46 = vmul.f32 2.0, %v427_v43  ;;  %v489_v3 = vadd.f32 %v1261_v35, %v453_v44 }
  0xb8   : > { %v504_v47 = vsub.f32 %v488_v41, %v496_v42  ;;  %v1278_v13 = vpop.eup %1277 }
  0xb9   : > { %v506_v48 = vsub.f32 %v490_v38, %v498_v46  ;;  %v1721_v36 = vsel %vm806_vm0, %v1278_v13, 0.0  ;;  %v1732_v46 = vadd.s32 %v1704_v12, %v707_v2 }
  0xba   : > { %v1694_v49 = vmax.f32 %v504_v47, 0.0 }
  0xbb   : > { %v1696_v52 = vmax.f32 %v506_v48, 0.0  ;;  %vm727_vm15 = vcmp.ne.s32.totalorder %v1732_v46, %v1496_v4  ;;  %vm735_vm0 = vcmp.lt.s32.totalorder %v1732_v46, 8 }
  0xbc   : > { %1279 = vrsqrt.f32 %v1694_v49  ;;  %v433_v33 = vpop.f32.mrf.mxu2  ;;  %v463_v55 = vpop.permute.xlu1 %462  ;;  %vm527_vm5 = vcmp.eq.f32.partialorder %v1694_v49, inf  ;;  %vm529_vm6 = vcmp.eq.f32.partialorder %v1694_v49, 0.0 }
  0xbd   : > { %v500_v56 = vmul.f32 2.0, %v433_v33  ;;  %v439_v57 = vpop.f32.mrf.mxu3  ;;  %v473_v58 = vpop.permute.xlu2 %472  ;;  %1281 = vrsqrt.f32 %v1696_v52  ;;  %v491_v15 = vadd.f32 %v1261_v35, %v463_v55  ;;  %vm551_vm8 = vcmp.eq.f32.partialorder %v1696_v52, inf }
  0xbe   : > { %v502_v59 = vmul.f32 2.0, %v439_v57  ;;  %v424_v62 = vpop.f32.mrf.mxu0  ;;  %v430_v63 = vpop.f32.mrf.mxu1  ;;  %v493_v30 = vadd.f32 %v1261_v35, %v473_v58  ;;  %vm553_vm9 = vcmp.eq.f32.partialorder %v1696_v52, 0.0 }
  0xbf   : > { %v508_v5 = vsub.f32 %v492_v50, %v500_v56  ;;  %v497_v6 = vmul.f32 2.0, %v424_v62  ;;  %v478_v10 = vpop.permute.xlu0 %477  ;;  %v499_v21 = vmul.f32 2.0, %v430_v63  ;;  %v530_v62 = vand.u32 2147483648, %v1694_v49 }
  0xc0   : > { %v494_v11 = vadd.f32 %v1261_v35, %v478_v10 }
  0xc1   : > { %v1706_v14 = vmax.f32 %v508_v5, 0.0  ;;  %v505_v20 = vsub.f32 %v489_v3, %v497_v6  ;;  %v507_v39 = vsub.f32 %v491_v15, %v499_v21 }
  0xc2   : > { %v1280_v22 = vpop.eup %1279  ;;  %v510_v23 = vsub.f32 %v494_v11, %v502_v59  ;;  %v554_v11 = vand.u32 2147483648, %v1696_v52 }
  0xc3   : > { %1283 = vrsqrt.f32 %v1706_v14  ;;  %v1710_v24 = vmax.f32 %v505_v20, 0.0  ;;  %v521_v25 = vmul.f32 %v1280_v22, %v1694_v49  ;;  %v1724_v38 = vpop.eup %1281  ;;  %v711_v20 = vadd.s32 48, %v1701_v1 }
  0xc4   : > { %v1717_v31 = vmax.f32 %v510_v23, 0.0  ;;  %v436_v28 = vpop.f32.mrf.mxu2  ;;  %v483_v34 = vpop.permute.xlu1 %482  ;;  %v545_v55 = vmul.f32 %v1724_v38, %v1696_v52  ;;  %vm575_vm10 = vcmp.eq.f32.partialorder %v1706_v14, inf  ;;  %vm577_vm11 = vcmp.eq.f32.partialorder %v1706_v14, 0.0 }
  0xc5   : > { %1285 = vrsqrt.f32 %v1710_v24  ;;  %v501_v40 = vmul.f32 2.0, %v436_v28  ;;  %v442_v41 = vpop.f32.mrf.mxu3  ;;  %v1727_v42 = vpop.permute.xlu2 %665  ;;  %v522_v43 = vmul.f32 %v1280_v22, %v521_v25  ;;  %v495_v45 = vadd.f32 %v1261_v35, %v483_v34 }
  0xc6   : > { %v503_v44 = vmul.f32 2.0, %v442_v41  ;;  %vm903_vm1 = vcmp.eq.s32.totalorder %v1496_v4, %v1727_v42  ;;  %1287 = vrsqrt.f32 %v1717_v31  ;;  %v1745_v35 = vadd.s32 %v1704_v12, %v709_v37 }
  0xc7   : > { %v509_v47 = vsub.f32 %v493_v30, %v501_v40  ;;  %v1735_v48 = vpop.permute.xlu0 %668  ;;  %v911_v50 = vsel %vm903_vm1, %v1521_v9, 0.0  ;;  %v523_v33 = vmul.f32 0.5, %v522_v43  ;;  %v1749_v9 = vmax.f32 %v507_v39, 0.0  ;;  %vm1812_vm1 = vmand %vm725_vm2, %vm2116_vm3 }
  0xc8   : > { %919 = vadd.xlane.f32.xlu0 %v911_v50  ;;  %vm904_vm4 = vcmp.eq.s32.totalorder %v1496_v4, %v1735_v48  ;;  %v511_v59 = vsub.f32 %v495_v45, %v503_v44  ;;  %v546_v3 = vmul.f32 %v1724_v38, %v545_v55  ;;  %v578_v25 = vand.u32 2147483648, %v1706_v14 }
  0xc9   : > { %v1284_v56 = vpop.eup %1283  ;;  %v912_v57 = vsel %vm904_vm4, %v1518_v8, 0.0  ;;  %v524_v58 = vsub.f32 1.5, %v523_v33  ;;  %v1759_v6 = vmax.f32 %v509_v47, 0.0  ;;  %v1764_v8 = vld [vmem:[%s2112_s3] ss:$0 sm:$0xff]  ;;  %1289 = vrsqrt.f32 %v1749_v9 }
  0xca   : > { %921 = vadd.xlane.f32.xlu2 %v912_v57  ;;  %v569_v63 = vmul.f32 %v1284_v56, %v1706_v14  ;;  %v547_v15 = vmul.f32 0.5, %v546_v3  ;;  %v1780_v30 = vmax.f32 %v511_v59, 0.0  ;;  %vm729_vm12 = vcmp.ne.s32.totalorder %v1745_v35, %v1496_v4 }
  0xcb   : > { %v1757_v5 = vpop.eup %1285  ;;  %v525_v10 = vmul.f32 %v1280_v22, %v524_v58  ;;  %vm737_vm13 = vcmp.lt.s32.totalorder %v1745_v35, 8  ;;  %1291 = vrsqrt.f32 %v1759_v6  ;;  %vm689_vm14 = vcmp.eq.s32.totalorder %v1727_v42, %v1764_v8 }
  0xcc   : > { %v570_v13 = vmul.f32 %v1284_v56, %v569_v63  ;;  %v533_v21 = vmul.f32 %v1757_v5, %v1710_v24  ;;  %v1772_v23 = vpop.eup %1287  ;;  %v1775_v2 = vpop.permute.xlu1 %671  ;;  %v548_v34 = vsub.f32 1.5, %v547_v15  ;;  %v1803_v45 = vadd.s32 %v1704_v12, %v711_v20 }
  0xcd   : > { %v526_v22 = vmul.f32 %v525_v10, %v1694_v49  ;;  %v593_v37 = vmul.f32 %v1772_v23, %v1717_v31  ;;  %1293 = vrsqrt.f32 %v1780_v30  ;;  %v602_v57 = vand.u32 2147483648, %v1717_v31 }
  0xce   : > { %v571_v28 = vmul.f32 0.5, %v570_v13  ;;  %v534_v40 = vmul.f32 %v1757_v5, %v533_v21  ;;  %v549_v44 = vmul.f32 %v1724_v38, %v548_v34  ;;  %vm691_vm4 = vcmp.eq.s32.totalorder %v1775_v2, %v1764_v8 }
  0xcf   : > { %v528_v39 = vsel %vm527_vm5, %v1694_v49, %v526_v22  ;;  %v594_v33 = vmul.f32 %v1772_v23, %v593_v37  ;;  %v1818_v58 = vpop.eup %1289  ;;  %vm1834_vm5 = vmand %vm1812_vm1, %vm749_vm7  ;;  %vm739_vm3 = vcmp.lt.s32.totalorder %v1803_v45, 8  ;;  %vm539_vm2 = vcmp.eq.f32.partialorder %v1710_v24, inf }
  0xd0   : > { %877 = vadd.xlane.f32.xlu0 %v1721_v36  ;;  %v531_v41 = vsel %vm529_vm6, %v530_v62, %v528_v39  ;;  %v572_v43 = vsub.f32 1.5, %v571_v28  ;;  %v535_v55 = vmul.f32 0.5, %v534_v40  ;;  %v550_v38 = vmul.f32 %v549_v44, %v1696_v52 }
  0xd1   : > { %v1140_v47 = vadd.f32 -0.2, %v531_v41  ;;  %v640_v50 = vsub.f32 1.0, %v531_v41  ;;  %v595_v63 = vmul.f32 0.5, %v594_v33  ;;  %v1828_v15 = vpop.eup %1291  ;;  %vm601_vm6 = vcmp.eq.f32.partialorder %v1717_v31, 0.0  ;;  %v1848_v41 = vpop.permute.xlu0 %674 }
  0xd2   : > { %v573_v36 = vmul.f32 %v1284_v56, %v572_v43  ;;  %v536_v3 = vsub.f32 1.5, %v535_v55  ;;  %v552_v13 = vsel %vm551_vm8, %v1696_v52, %v550_v38  ;;  %v706_v56 = vadd.s32 8, %v1701_v1 }
  0xd3   : > { %v624_v59 = vmax.f32 %v1140_v47, 0.0  ;;  %v648_v62 = vmax.f32 %v640_v50, 0.0  ;;  %v555_v28 = vsel %vm553_vm9, %v554_v11, %v552_v13  ;;  %vm731_vm8 = vcmp.ne.s32.totalorder %v1803_v45, %v1496_v4  ;;  %v1859_v47 = vpop.eup %1293 }
  0xd4   : > { %v574_v10 = vmul.f32 %v573_v36, %v1706_v14  ;;  %v1142_v37 = vadd.f32 -0.2, %v555_v28  ;;  %v642_v39 = vsub.f32 1.0, %v555_v28  ;;  %v596_v40 = vsub.f32 1.5, %v595_v63  ;;  %v1850_v52 = vpop.permute.xlu1 %677 }
  0xd5   : > { %v632_v20 = vmul.f32 %v624_v59, %v624_v59  ;;  %v656_v21 = vmul.f32 %v648_v62, %v648_v62  ;;  %v537_v44 = vmul.f32 %v1757_v5, %v536_v3  ;;  %vm541_vm9 = vcmp.eq.f32.partialorder %v1710_v24, 0.0 }
  0xd6   : > { %v576_v34 = vsel %vm575_vm10, %v1706_v14, %v574_v10  ;;  %v1864_v49 = vadd.s32 %v1704_v12, %v706_v56  ;;  %vm1871_vm10 = vmand %vm729_vm12, %vm737_vm13  ;;  %v626_v42 = vmax.f32 %v1142_v37, 0.0  ;;  %v650_v5 = vmax.f32 %v642_v39, 0.0 }
  0xd7   : > { %v697_v11 = vsel %vm689_vm14, %v632_v20, %v656_v21  ;;  %v579_v43 = vsel %vm577_vm11, %v578_v25, %v576_v34  ;;  %v597_v25 = vmul.f32 %v1772_v23, %v596_v40  ;;  %v538_v36 = vmul.f32 %v537_v44, %v1710_v24  ;;  %vm743_vm12 = vmand %vm727_vm15, %vm735_vm0  ;;  %v1962_v34 = vpop.permute.xlu2 %680 }
  0xd8   : > { %v758_v50 = vsel %vm1834_vm5, %v697_v11, 0.0  ;;  %v1144_v33 = vadd.f32 -0.2, %v579_v43  ;;  %v644_v55 = vsub.f32 1.0, %v579_v43  ;;  %vm693_vm11 = vcmp.eq.s32.totalorder %v1850_v52, %v1764_v8  ;;  %vm1893_vm14 = vmand %vm1871_vm10, %vm749_vm7 }
  0xd9   : > { %766 = vadd.xlane.f32.xlu0 %v758_v50  ;;  %v542_v62 = vand.u32 2147483648, %v1710_v24  ;;  %v634_v63 = vmul.f32 %v626_v42, %v626_v42  ;;  %v658_v3 = vmul.f32 %v650_v5, %v650_v5  ;;  %v598_v10 = vmul.f32 %v597_v25, %v1717_v31  ;;  %vm1906_vm15 = vmand %vm743_vm12, %vm749_vm7  ;;  %v1935_v42 = vpop.permute.xlu0 %683 }
  0xda   : > { %v628_v38 = vmax.f32 %v1144_v33, 0.0  ;;  %v652_v59 = vmax.f32 %v644_v55, 0.0  ;;  %v540_v23 = vsel %vm539_vm2, %v1710_v24, %v538_v36  ;;  %v557_v22 = vmul.f32 %v1818_v58, %v1749_v9  ;;  %vm1930_vm5 = vmand %vm731_vm8, %vm739_vm3 }
  0xdb   : > { %v543_v21 = vsel %vm541_vm9, %v542_v62, %v540_v23  ;;  %v699_v28 = vsel %vm691_vm4, %v634_v63, %v658_v3  ;;  %vm2129_vm1 = vcmp.eq.f32.partialorder %v1717_v31, inf  ;;  %vm726_vm2 = vcmp.ne.s32.totalorder %v1864_v49, %v1496_v4  ;;  %vm756_vm9 = vmand %vm1930_vm5, %vm749_vm7 }
  0xdc   : > { %v636_v13 = vmul.f32 %v628_v38, %v628_v38  ;;  %v660_v56 = vmul.f32 %v652_v59, %v652_v59  ;;  %v600_v37 = vsel %vm2129_vm1, %v1717_v31, %v598_v10  ;;  %v1141_v39 = vadd.f32 -0.2, %v543_v21 }
  0xdd   : > { %v603_v40 = vsel %vm601_vm6, %v602_v57, %v600_v37  ;;  %v641_v11 = vsub.f32 1.0, %v543_v21  ;;  %vm734_vm4 = vcmp.lt.s32.totalorder %v1864_v49, 8  ;;  %v760_v55 = vsel %vm1906_vm15, %v699_v28, 0.0 }
  0xde   : > { %v701_v24 = vsel %vm693_vm11, %v636_v13, %v660_v56  ;;  %v1146_v44 = vadd.f32 -0.2, %v603_v40  ;;  %v646_v50 = vsub.f32 1.0, %v603_v40  ;;  %v625_v33 = vmax.f32 %v1141_v39, 0.0  ;;  %vm742_vm6 = vmand %vm726_vm2, %vm734_vm4 }
  0xdf   : > { %v762_v43 = vsel %vm1893_vm14, %v701_v24, 0.0  ;;  %v649_v57 = vmax.f32 %v641_v11, 0.0  ;;  %v558_v14 = vmul.f32 %v1818_v58, %v557_v22  ;;  %v708_v62 = vadd.s32 24, %v1701_v1  ;;  %vm751_vm11 = vmand %vm742_vm6, %vm749_vm7 }
  0xe0   : > { %774 = vadd.xlane.f32.xlu2 %v762_v43  ;;  %v630_v5 = vmax.f32 %v1146_v44, 0.0  ;;  %v654_v25 = vmax.f32 %v646_v50, 0.0  ;;  %v633_v36 = vmul.f32 %v625_v33, %v625_v33  ;;  %vm690_vm8 = vcmp.eq.s32.totalorder %v1735_v48, %v1764_v8 }
  0xe1   : > { %770 = vadd.xlane.f32.xlu0 %v760_v55  ;;  %v657_v38 = vmul.f32 %v649_v57, %v649_v57  ;;  %v559_v59 = vmul.f32 0.5, %v558_v14  ;;  %vm695_vm10 = vcmp.eq.s32.totalorder %v1935_v42, %v1764_v8  ;;  %vm906_vm12 = vcmp.eq.s32.totalorder %v1496_v4, %v1848_v41 }
  0xe2   : > { %v638_v63 = vmul.f32 %v630_v5, %v630_v5  ;;  %v662_v3 = vmul.f32 %v654_v25, %v654_v25  ;;  %v581_v48 = vmul.f32 %v1828_v15, %v1759_v6  ;;  %v1959_v21 = vadd.s32 %v1704_v12, %v708_v62 }
  0xe3   : > { %v698_v10 = vsel %vm690_vm8, %v633_v36, %v657_v38  ;;  %v560_v23 = vsub.f32 1.5, %v559_v59  ;;  %v914_v37 = vsel %vm906_vm12, %v1560_v19, 0.0  ;;  %vm563_vm14 = vcmp.eq.f32.partialorder %v1749_v9, inf }
  0xe4   : > { %v703_v13 = vsel %vm695_vm10, %v638_v63, %v662_v3  ;;  %v759_v22 = vsel %vm751_vm11, %v698_v10, 0.0  ;;  %v582_v28 = vmul.f32 %v1828_v15, %v581_v48  ;;  %v605_v24 = vmul.f32 %v1859_v47, %v1780_v30 }
  0xe5   : > { %v764_v56 = vsel %vm756_vm9, %v703_v13, 0.0  ;;  %v561_v20 = vmul.f32 %v1818_v58, %v560_v23  ;;  %vm565_vm15 = vcmp.eq.f32.partialorder %v1749_v9, 0.0  ;;  %v566_v58 = vand.u32 2147483648, %v1749_v9 }
  0xe6   : > { %778 = vadd.xlane.f32.xlu1 %v764_v56  ;;  %v583_v40 = vmul.f32 0.5, %v582_v28  ;;  %v710_v11 = vadd.s32 40, %v1701_v1  ;;  %vm728_vm1 = vcmp.ne.s32.totalorder %v1959_v21, %v1496_v4  ;;  %vm736_vm2 = vcmp.lt.s32.totalorder %v1959_v21, 8 }
  0xe7   : > { %v562_v39 = vmul.f32 %v561_v20, %v1749_v9  ;;  %v606_v19 = vmul.f32 %v1859_v47, %v605_v24  ;;  %vm905_vm5 = vcmp.eq.s32.totalorder %v1496_v4, %v1775_v2  ;;  %vm908_vm6 = vcmp.eq.s32.totalorder %v1496_v4, %v1962_v34  ;;  %vm744_vm9 = vmand %vm728_vm1, %vm736_vm2 }
  0xe8   : > { %768 = vadd.xlane.f32.xlu2 %v759_v22  ;;  %v584_v50 = vsub.f32 1.5, %v583_v40  ;;  %vm692_vm8 = vcmp.eq.s32.totalorder %v1848_v41, %v1764_v8  ;;  %v1988_v14 = vadd.s32 %v1704_v12, %v710_v11  ;;  %v913_v25 = vsel %vm905_vm5, %v1515_v7, 0.0  ;;  %vm1997_vm11 = vmand %vm744_vm9, %vm749_vm7 }
  0xe9   : > { %925 = vadd.xlane.f32.xlu0 %v914_v37  ;;  %v564_v43 = vsel %vm563_vm14, %v1749_v9, %v562_v39  ;;  %v607_v31 = vmul.f32 0.5, %v606_v19  ;;  %v712_v9 = vadd.s32 56, %v1701_v1  ;;  %v916_v38 = vsel %vm908_vm6, %v1554_v17, 0.0 }
  0xea   : > { %v567_v44 = vsel %vm565_vm15, %v566_v58, %v564_v43  ;;  %v585_v57 = vmul.f32 %v1828_v15, %v584_v50  ;;  %vm587_vm10 = vcmp.eq.f32.partialorder %v1759_v6, inf  ;;  %v590_v62 = vand.u32 2147483648, %v1759_v6 }
  0xeb   : > { %v1143_v33 = vadd.f32 -0.2, %v567_v44  ;;  %v643_v55 = vsub.f32 1.0, %v567_v44  ;;  %v608_v36 = vsub.f32 1.5, %v607_v31  ;;  %v2003_v10 = vadd.s32 %v1704_v12, %v712_v9 }
  0xec   : > { %v586_v59 = vmul.f32 %v585_v57, %v1759_v6  ;;  %vm589_vm12 = vcmp.eq.f32.partialorder %v1759_v6, 0.0  ;;  %vm730_vm14 = vcmp.ne.s32.totalorder %v1988_v14, %v1496_v4  ;;  %vm611_vm15 = vcmp.eq.f32.partialorder %v1780_v30, inf }
  0xed   : > { %v627_v2 = vmax.f32 %v1143_v33, 0.0  ;;  %v651_v5 = vmax.f32 %v643_v55, 0.0  ;;  %v609_v7 = vmul.f32 %v1859_v47, %v608_v36  ;;  %vm738_vm1 = vcmp.lt.s32.totalorder %v1988_v14, 8 }
  0xee   : > { %v588_v17 = vsel %vm587_vm10, %v1759_v6, %v586_v59  ;;  %v614_v6 = vand.u32 2147483648, %v1780_v30  ;;  %vm613_vm5 = vcmp.eq.f32.partialorder %v1780_v30, 0.0  ;;  %vm732_vm6 = vcmp.ne.s32.totalorder %v2003_v10, %v1496_v4  ;;  %vm746_vm9 = vmand %vm730_vm14, %vm738_vm1 }
  0xef   : > { %v635_v63 = vmul.f32 %v627_v2, %v627_v2  ;;  %v659_v3 = vmul.f32 %v651_v5, %v651_v5  ;;  %v591_v13 = vsel %vm589_vm12, %v590_v62, %v588_v17  ;;  %v610_v12 = vmul.f32 %v609_v7, %v1780_v30  ;;  %vm755_vm12 = vmand %vm746_vm9, %vm749_vm7 }
  0xf0   : > { %923 = vadd.xlane.f32.xlu2 %v913_v25  ;;  %v1145_v48 = vadd.f32 -0.2, %v591_v13  ;;  %v645_v56 = vsub.f32 1.0, %v591_v13  ;;  %vm2134_vm9 = vcmp.lt.s32.totalorder %v1715_v27, 8 }
  0xf1   : > { %929 = vadd.xlane.f32.xlu0 %v916_v38  ;;  %v700_v23 = vsel %vm692_vm8, %v635_v63, %v659_v3  ;;  %v612_v20 = vsel %vm611_vm15, %v1780_v30, %v610_v12  ;;  %vm740_vm8 = vcmp.lt.s32.totalorder %v2003_v10, 8  ;;  %v687_v30 = vpop.permute.xlu1 %686 }
  0xf2   : > { %v761_v47 = vsel %vm1997_vm11, %v700_v23, 0.0  ;;  %v629_v41 = vmax.f32 %v1145_v48, 0.0  ;;  %v653_v22 = vmax.f32 %v645_v56, 0.0  ;;  %v615_v28 = vsel %vm613_vm5, %v614_v6, %v612_v20  ;;  %vm748_vm10 = vmand %vm732_vm6, %vm740_vm8 }
  0xf3   : > { %772 = vadd.xlane.f32.xlu1 %v761_v47  ;;  %v1147_v37 = vadd.f32 -0.2, %v615_v28  ;;  %v647_v39 = vsub.f32 1.0, %v615_v28  ;;  %vm694_vm11 = vcmp.eq.s32.totalorder %v1962_v34, %v1764_v8  ;;  %vm757_vm14 = vmand %vm748_vm10, %vm749_vm7  ;;  %vm696_vm15 = vcmp.eq.s32.totalorder %v687_v30, %v1764_v8 }
  0xf4   : > { %v637_v24 = vmul.f32 %v629_v41, %v629_v41  ;;  %v661_v58 = vmul.f32 %v653_v22, %v653_v22  ;;  %vm907_vm5 = vcmp.eq.s32.totalorder %v1496_v4, %v1850_v52  ;;  %vm909_vm6 = vcmp.eq.s32.totalorder %v1496_v4, %v1935_v42 }
  0xf5   : > { %v631_v40 = vmax.f32 %v1147_v37, 0.0  ;;  %v655_v11 = vmax.f32 %v647_v39, 0.0  ;;  %v915_v34 = vsel %vm907_vm5, %v1590_v26, 0.0  ;;  %v917_v31 = vsel %vm909_vm6, %v1551_v16, 0.0 }
  0xf6   : > { %v702_v43 = vsel %vm694_vm11, %v637_v24, %v661_v58  ;;  %vm910_vm7 = vcmp.eq.s32.totalorder %v1496_v4, %v687_v30 }
  0xf7   : > { %v639_v19 = vmul.f32 %v631_v40, %v631_v40  ;;  %v663_v44 = vmul.f32 %v655_v11, %v655_v11  ;;  %v763_v50 = vsel %vm755_vm12, %v702_v43, 0.0  ;;  %v918_v8 = vsel %vm910_vm7, %v1611_v32, 0.0 }
  0xf9   : > { %v704_v33 = vsel %vm696_vm15, %v639_v19, %v663_v44 }
  0xfa   : > { %v765_v55 = vsel %vm757_vm14, %v704_v33, 0.0 }
  0xfb   : > { %776 = vadd.xlane.f32.xlu1 %v763_v50  ;;  %780 = vadd.xlane.f32.xlu2 %v765_v55 }
 0x103   : > { %927 = vadd.xlane.f32.xlu1 %v915_v34  ;;  %931 = vadd.xlane.f32.xlu2 %v917_v31 }
 0x10b   : > { %933 = vadd.xlane.f32.xlu1 %v918_v8 }
 0x111   : > { %v868_v5 = vpop.xlane.xlu1 %867 }
 0x112   : > { %v866_v57 = vpop.xlane.xlu2 %865 }
 0x113   : > { %v864_v9 = vpop.xlane.xlu0 %863  ;;  %1295 = vlog2.f32 %v866_v57 }
 0x114   : > { %1297 = vlog2.f32 %v868_v5 }
 0x115   : > { %1299 = vlog2.f32 %v864_v9 }
 0x119   : > { %v1296_v15 = vpop.eup %1295 }
 0x11a   : > { %v1298_v7 = vpop.eup %1297  ;;  %v882_v23 = vmul.f32 0.6931472, %v1296_v15 }
 0x11b   : > { %v874_v2 = vpop.xlane.xlu0 %873  ;;  %v1300_v17 = vpop.eup %1299  ;;  %v884_v48 = vmul.f32 0.6931472, %v1298_v7 }
 0x11c   : > { %v870_v36 = vpop.xlane.xlu1 %869  ;;  %v880_v56 = vmul.f32 0.6931472, %v1300_v17  ;;  %v896_v20 = vadd.f32 %v882_v23, %v1649_v53 }
 0x11d   : > { %1301 = vlog2.f32 %v870_v36  ;;  %v897_v39 = vadd.f32 %v884_v48, %v1645_v51 }
 0x11e   : > { %1303 = vlog2.f32 %v874_v2  ;;  %v895_v28 = vadd.f32 %v880_v56, %v1651_v54 }
 0x123   : > { %v1302_v6 = vpop.eup %1301 }
 0x124   : > { %v872_v25 = vpop.xlane.xlu2 %871  ;;  %v876_v26 = vpop.xlane.xlu1 %875  ;;  %v886_v24 = vmul.f32 0.6931472, %v1302_v6 }
 0x125   : > { %1305 = vlog2.f32 %v872_v25  ;;  %v1304_v58 = vpop.eup %1303 }
 0x126   : > { %1307 = vlog2.f32 %v876_v26  ;;  %v890_v53 = vmul.f32 0.6931472, %v1304_v58  ;;  %v898_v55 = vadd.f32 %v886_v24, %v1663_v0 }
 0x12b   : > { %v1306_v43 = vpop.eup %1305 }
 0x12c   : > { %v1308_v44 = vpop.eup %1307  ;;  %v888_v34 = vmul.f32 0.6931472, %v1306_v43 }
 0x12d   : > { %v892_v9 = vmul.f32 0.6931472, %v1308_v44 }
 0x12e   : > { %v899_v0 = vadd.f32 %v888_v34, %v1675_v18 }
 0x12f   : > { %v901_v27 = vadd.f32 %v892_v9, %v1659_v61 }
 0x13b   : > { %v920_v52 = vpop.xlane.xlu0 %919 }
 0x13c   : > { %v935_v30 = vsub.f32 %v895_v28, %v920_v52  ;;  %v900_v52 = vadd.f32 %v890_v53, %v1657_v60 }
 0x13d   : > { %v922_v38 = vpop.xlane.xlu2 %921 }
 0x13e   : > { %v936_v37 = vsub.f32 %v896_v20, %v922_v38  ;;  %v943_v51 = vsel %vm2134_vm9, %v935_v30, 0.0 }
 0x140   : > { %v944_v50 = vsel %vm734_vm4, %v936_v37, 0.0  ;;  %vm974_vm4 = vcmp.eq.s32.totalorder %v1496_v4, 0 }
 0x141   : > { %v959_v57 = vadd.f32 %v944_v50, %v943_v51 }
 0x143   : > { %v878_v42 = vpop.xlane.xlu0 %877 }
 0x144   : > { %1309 = vlog2.f32 %v878_v42 }
 0x14a   : > { %v1310_v38 = vpop.eup %1309 }
 0x14c   : > { %v767_v62 = vpop.xlane.xlu0 %766 }
 0x153   : > { %v775_v59 = vpop.xlane.xlu2 %774 }
 0x154   : > { %v771_v3 = vpop.xlane.xlu0 %770 }
 0x159   : > { %v779_v16 = vpop.xlane.xlu1 %778 }
 0x15b   : > { %v769_v63 = vpop.xlane.xlu2 %768 }
 0x15c   : > { %v782_v32 = vadd.f32 %v769_v63, %v767_v62  ;;  %v926_v22 = vpop.xlane.xlu0 %925 }
 0x15d   : > { %v938_v2 = vsub.f32 %v898_v55, %v926_v22 }
 0x15e   : > { %v783_v13 = vadd.f32 %v782_v32, %v771_v3  ;;  %v894_v3 = vmul.f32 0.6931472, %v1310_v38 }
 0x15f   : > { %v946_v46 = vsel %vm736_vm2, %v938_v2, 0.0 }
 0x160   : > { %v902_v17 = vadd.f32 %v894_v3, %v1683_v29 }
 0x163   : > { %v924_v47 = vpop.xlane.xlu2 %923 }
 0x164   : > { %v937_v40 = vsub.f32 %v897_v39, %v924_v47  ;;  %v930_v25 = vpop.xlane.xlu0 %929 }
 0x166   : > { %v773_v12 = vpop.xlane.xlu1 %772  ;;  %v945_v31 = vsel %vm735_vm0, %v937_v40, 0.0 }
 0x167   : > { %v784_v41 = vadd.f32 %v783_v13, %v773_v12  ;;  %v960_v49 = vadd.f32 %v959_v57, %v945_v31 }
 0x169   : > { %v785_v11 = vadd.f32 %v784_v41, %v775_v59  ;;  %v940_v59 = vsub.f32 %v900_v52, %v930_v25 }
 0x16b   : > { %v948_v7 = vsel %vm738_vm1, %v940_v59, 0.0 }
 0x16e   : > { %v777_v19 = vpop.xlane.xlu1 %776  ;;  %v781_v54 = vpop.xlane.xlu2 %780 }
 0x16f   : > { %v786_v33 = vadd.f32 %v785_v11, %v777_v19 }
 0x171   : > { %v787_v8 = vadd.f32 %v786_v33, %v779_v16  ;;  %v961_v16 = vadd.f32 %v960_v49, %v946_v46 }
 0x173   : > { %v788_v5 = vadd.f32 %v787_v8, %v781_v54 }
 0x175   : > { %v789_v36 = vrot.slane %v788_v5, 4 }
 0x176   : > { %v928_v42 = vpop.xlane.xlu1 %927  ;;  %v932_v63 = vpop.xlane.xlu2 %931 }
 0x177   : > { %v790_v26 = vadd.f32 %v789_v36, %v788_v5  ;;  %v939_v62 = vsub.f32 %v899_v0, %v928_v42  ;;  %v941_v60 = vsub.f32 %v901_v27, %v932_v63 }
 0x179   : > { %v947_v32 = vsel %vm737_vm13, %v939_v62, 0.0  ;;  %v791_v15 = vrot.slane %v790_v26, 2  ;;  %v949_v21 = vsel %vm739_vm3, %v941_v60, 0.0  ;;  %vm797_vm13 = vcmp.eq.s32.totalorder %v1701_v1, 0 }
 0x17a   : > { %v962_v18 = vadd.f32 %v961_v16, %v947_v32  ;;  %vm798_vm3 = vcmp.eq.s32.totalorder %v1496_v4, 1  ;;  %vm975_vm2 = vmand %vm797_vm13, %vm974_vm4 }
 0x17b   : > { %v792_v23 = vadd.f32 %v791_v15, %v790_v26  ;;  %vm799_vm0 = vmand %vm797_vm13, %vm798_vm3 }
 0x17c   : > { %v963_v61 = vadd.f32 %v962_v18, %v948_v7 }
 0x17d   : > { %v793_v48 = vrot.slane %v792_v23, 1 }
 0x17e   : > { %v934_v13 = vpop.xlane.xlu1 %933  ;;  %v964_v47 = vadd.f32 %v963_v61, %v949_v21 }
 0x17f   : > { %v942_v12 = vsub.f32 %v902_v17, %v934_v13  ;;  %v794_v20 = vadd.f32 %v793_v48, %v792_v23 }
 0x181   : > { %v950_v35 = vsel %vm740_vm8, %v942_v12, 0.0  ;;  %v795_v29 = vmul.f32 0.008928572, %v794_v20 }
 0x182   : > { %v965_v56 = vadd.f32 %v964_v47, %v950_v35 }
 0x183   : > { %v800_v10 = vsel %vm799_vm0, %v795_v29, 0.0 }
 0x184   : > { %v966_v6 = vrot.slane %v965_v56, 4 }
 0x186   : > { %v967_v14 = vadd.f32 %v966_v6, %v965_v56 }
 0x188   : > { %v968_v45 = vrot.slane %v967_v14, 2 }
 0x18a   : > { %v969_v41 = vadd.f32 %v968_v45, %v967_v14 }
 0x18c   : > { %v970_v22 = vrot.slane %v969_v41, 1 }
 0x18e   : > { %v971_v28 = vadd.f32 %v970_v22, %v969_v41 }
 0x190   : > { %v972_v37 = vmul.f32 0.125, %v971_v28 }
 0x192   : > { %v976_v1 = vsel %vm975_vm2, %v972_v37, 0.0 }
 0x193   : > { %v977_v39 = vadd.f32 %v976_v1, %v800_v10 }
 0x195   : > { %978 = vst [vmem:[%s324_s16] sm:$0xff] %v977_v39 }
 0x196   : > { %1338 = shalt.err (!%p1335_p5)
}
 0x197   : > { %1201 = dma.vmem_to_hbm [thread:$0]  (%p1467_p4), %s993_s12, 128, %s995_s17, %s980_s18  }
 0x198 PF: > { %p1207_p6 = scmp.ge.s32.totalorder %s1389_s26, 2  ;;  %s1006_s30 = sand.u32 1, %s1369_s21  }
 0x199   : > { %s1007_s11 = scalar_lea.sflag [#allocation3], %s1006_s30 }
 0x19a   : > { %p1204_p7 = pnand %p1207_p6, %p1474_p8 }
 0x19c   : > { %p1205_p9 = pneg %p1204_p7 }
 0x19e   : > { %1364 = dma.done.wait (%p1205_p9), %s1007_s11, 128  }
 0x19f   : > { %1366 = vsyncadd (%p1205_p9), %s1007_s11, 4294967168  ;;  %s19_s26 = sadd.s32 1, %s1389_s26   ;;  %s2135_s21 = smov %s1373_s22 }
 0x1a0   : > { %p16_p10 = scmp.ge.s32.totalorder %s19_s26, 4   ;;  %s2136_s22 = smov %s1377_s23 }
 0x1a1   : > { %s2137_s23 = smov %s1480_s10  ;;  %s2138_s24 = smov %s1385_s25 }
 0x1a2   : > { %s2139_s25 = smov %s2141_s29  ;;  %18 = sbr.rel (!%p16_p10) target bundleno = 4 (0x4), region = 102 }
 0x1a7   :  { %1013 = vsyncpa [#allocation3], 1 }
 0x1a8   :  { %1015 = vsyncpa [#allocation3 + $0x1], 1 }

</bundles_post_ra>
